<compile_context>
chip_gen: v7x
topology: tpu7x:2x2x1
jax: 0.10.0
libtpu: 0.0.40
codegen_flags: <defaults>
</compile_context>

<pallas_src>
import functools

import jax
import jax.numpy as jnp
from jax import lax
from jax.experimental import pallas as pl
from jax.experimental.pallas import tpu as pltpu


_LANE = 128
_CHUNK_TARGET = 512                      # lanes per in-kernel streaming chunk
_FUSED_BLOCK_BYTES = 4 * 1024 * 1024     # per-block (in + out, single copy) target
_MIN_GRID_STEPS = 8                      # aim for >= this many grid steps
_VMEM_LIMIT = 32 * 1024 * 1024           # modest scoped-VMEM limit (blocks are a few MiB)


# ---------------------------------------------------------------------------
# Kernels
# ---------------------------------------------------------------------------

def _ccbn_fused_kernel(x_ref, w_ref, b_ref, o_ref, *, eps, chunk, n_chunks):
    """Fused path. x_ref/o_ref: (N, Cb, HW) block; w_ref/b_ref: (N, C, 1) tables."""
    N, cb, _ = x_ref.shape
    inv_count = 1.0 / float(N * n_chunks * chunk)
    c_off = pl.multiple_of(pl.program_id(0) * cb, 8)
    unroll = min(n_chunks, 8)

    def load_chunk(ci):
        off = pl.multiple_of(ci * chunk, chunk)
        return x_ref[:, :, pl.ds(off, chunk)].astype(jnp.float32)

    # Pass 1: per-channel mean (f32 accumulation, streamed over HW chunks).
    def sum_body(ci, s):
        return s + jnp.sum(load_chunk(ci), axis=(0, 2), keepdims=True)

    s = lax.fori_loop(0, n_chunks, sum_body,
                      jnp.zeros((1, cb, 1), jnp.float32), unroll=unroll)
    mean = s * inv_count                                        # (1, Cb, 1)

    # Pass 2: centered sum of squares (avoids E[x^2]-E[x]^2 cancellation).
    def ssq_body(ci, ss):
        d = load_chunk(ci) - mean
        return ss + jnp.sum(d * d, axis=(0, 2), keepdims=True)

    ss = lax.fori_loop(0, n_chunks, ssq_body,
                       jnp.zeros((1, cb, 1), jnp.float32), unroll=unroll)
    inv_std = lax.rsqrt(ss * inv_count + eps)                   # (1, Cb, 1)

    # Fold batch stats and the category-conditioned affine into one mul+add.
    w = w_ref[:, pl.ds(c_off, cb), :].astype(jnp.float32)       # (N, Cb, 1)
    b = b_ref[:, pl.ds(c_off, cb), :].astype(jnp.float32)
    scale = inv_std * w
    shift = b - mean * scale

    # Hoist the lane broadcast out of the apply loop (no per-iter broadcast).
    scale_b = jnp.broadcast_to(scale, (N, cb, chunk))
    shift_b = jnp.broadcast_to(shift, (N, cb, chunk))

    # Pass 3: out = x * scale + shift, streamed over HW chunks.
    def apply_body(ci, carry):
        off = pl.multiple_of(ci * chunk, chunk)
        xc = x_ref[:, :, pl.ds(off, chunk)].astype(jnp.float32)
        o_ref[:, :, pl.ds(off, chunk)] = (xc * scale_b + shift_b).astype(o_ref.dtype)
        return carry

    lax.fori_loop(0, n_chunks, apply_body, 0, unroll=unroll)


def _ccbn_stats_kernel(x_ref, mean_ref, var_ref, *, total_count):
    """Fallback stats: Chan/Welford merge of per-HW-block stats across grid axis 1.

    x_ref: (N, Cb, Hb) block.  mean_ref / var_ref: (1, Cb, 1) resident output
    accumulators (var_ref holds the running centered M2 until the final step).
    """
    h = pl.program_id(1)
    xc = x_ref[...].astype(jnp.float32)
    nb = float(x_ref.shape[0] * x_ref.shape[2])

    sum_b = jnp.sum(xc, axis=(0, 2), keepdims=True)             # (1, Cb, 1)
    mean_b = sum_b * (1.0 / nb)
    d = xc - mean_b
    m2_b = jnp.sum(d * d, axis=(0, 2), keepdims=True)

    @pl.when(h == 0)
    def _():
        mean_ref[...] = mean_b
        var_ref[...] = m2_b

    @pl.when(h > 0)
    def _():
        mean_a = mean_ref[...]
        m2_a = var_ref[...]
        n_a = jnp.broadcast_to(
            (h * (x_ref.shape[0] * x_ref.shape[2])).astype(jnp.float32), (1, 1, 1))
        n_b = jnp.full((1, 1, 1), nb, jnp.float32)
        n_tot = n_a + n_b
        delta = mean_b - mean_a
        mean_ref[...] = mean_a + delta * (n_b / n_tot)
        var_ref[...] = m2_a + m2_b + delta * delta * (n_a * n_b / n_tot)

    @pl.when(h == pl.num_programs(1) - 1)
    def _():
        var_ref[...] = var_ref[...] * (1.0 / float(total_count))


def _ccbn_apply_kernel(x_ref, scale_ref, shift_ref, o_ref):
    """Fallback apply: out = x * scale + shift with per-(n, c) scale/shift."""
    xc = x_ref[...].astype(jnp.float32)
    o_ref[...] = (xc * scale_ref[...] + shift_ref[...]).astype(o_ref.dtype)


def _ccbn_lane_dense_kernel(x_ref, w_ref, b_ref, o_ref, *, eps):
    """Small-HW path. x_ref/o_ref: (N, HW, C); w_ref/b_ref: (N, 1, C)."""
    xf = x_ref[...].astype(jnp.float32)
    inv_count = 1.0 / float(x_ref.shape[0] * x_ref.shape[1])
    mean = jnp.sum(xf, axis=(0, 1), keepdims=True) * inv_count          # (1,1,C)
    d = xf - mean
    var = jnp.sum(d * d, axis=(0, 1), keepdims=True) * inv_count
    inv_std = lax.rsqrt(var + eps)
    scale = w_ref[...].astype(jnp.float32) * inv_std                     # (N,1,C)
    shift = b_ref[...].astype(jnp.float32) - mean * scale
    o_ref[...] = (xf * scale + shift).astype(o_ref.dtype)


# ---------------------------------------------------------------------------
# Tiling policy
# ---------------------------------------------------------------------------

def _choose_chunk(hw):
    """Largest lane-aligned divisor of hw that is <= _CHUNK_TARGET (else hw)."""
    if hw <= _CHUNK_TARGET or hw % _LANE != 0:
        return hw
    c = (_CHUNK_TARGET // _LANE) * _LANE
    while c >= _LANE:
        if hw % c == 0:
            return c
        c -= _LANE
    return hw


def _plan_fused_cblk(N, C, HW, itemsize, block_bytes):
    """Channel tile for the fused path, or None if a whole-HW slab can't fit."""
    per_channel = 2 * N * HW * itemsize              # in + out, single copy
    bytes_cap = block_bytes // per_channel
    if bytes_cap < 1:
        return None
    if C % 8 != 0:
        return C if C <= bytes_cap else None         # full-extent channel block
    cap = min(bytes_cap, max(8, C // _MIN_GRID_STEPS))
    if cap < 8:
        return None
    best = None
    t = 8
    limit = min(cap, C)
    while t <= limit:
        if C % t == 0:
            best = t
        t += 8
    return best


def _plan_fallback(N, C, HW, itemsize, block_bytes):
    """(cblk, hblk) for the two-kernel HW-tiled path."""
    cblk = 8 if C % 8 == 0 else C
    if HW % _LANE != 0:
        # TODO(synk): non-128-aligned HW too large for VMEM is not HW-tiled.
        return cblk, HW
    per_lane = 2 * N * cblk * itemsize
    lanes_cap = max(_LANE, block_bytes // per_lane)
    hblk = _LANE
    t = _LANE
    limit = min(HW, lanes_cap)
    while t <= limit:
        if HW % t == 0:
            hblk = t
        t += _LANE
    return cblk, hblk


# ---------------------------------------------------------------------------
# Wrapper
# ---------------------------------------------------------------------------

def categorical_conditional_batch_norm(x, cats, weight, bias, *, eps=2e-5,
                                       block_bytes=_FUSED_BLOCK_BYTES):
    """Training-mode forward of CategoricalConditionalBatchNorm.

    x:      (N, C, H, W) float (f32 or bf16)
    cats:   (N,) int32 category ids in [0, num_cats)
    weight: (num_cats, C) float
    bias:   (num_cats, C) float
    Returns (out, cats) with out of shape (N, C, H, W) in x.dtype.
    """
    N, C, H, W = x.shape
    HW = H * W
    itemsize = x.dtype.itemsize

    # Tiny per-sample gather of the category-conditioned affine rows (glue).
    w_sel = weight[cats].astype(jnp.float32)          # (N, C)
    b_sel = bias[cats].astype(jnp.float32)

    # --- path 3: lane-dense layout for small feature maps (HW < 128) ---------
    if HW < _LANE:
        x_ld = jnp.transpose(x.reshape(N, C, HW), (0, 2, 1))            # (N, HW, C)
        out_ld = pl.pallas_call(
            functools.partial(_ccbn_lane_dense_kernel, eps=float(eps)),
            out_shape=jax.ShapeDtypeStruct((N, HW, C), x.dtype),
            grid_spec=pltpu.PrefetchScalarGridSpec(
                num_scalar_prefetch=0, grid=(1,),
                in_specs=[
                    pl.BlockSpec((N, HW, C), lambda i: (0, 0, 0)),
                    pl.BlockSpec((N, 1, C), lambda i: (0, 0, 0)),
                    pl.BlockSpec((N, 1, C), lambda i: (0, 0, 0)),
                ],
                out_specs=pl.BlockSpec((N, HW, C), lambda i: (0, 0, 0))),
            compiler_params=pltpu.CompilerParams(
                dimension_semantics=("arbitrary",),
                vmem_limit_bytes=_VMEM_LIMIT),
        )(x_ld, w_sel.reshape(N, 1, C), b_sel.reshape(N, 1, C))
        out = jnp.transpose(out_ld, (0, 2, 1)).reshape(N, C, H, W)
        return out, cats

    x3 = x.reshape(N, C, HW)
    w3 = w_sel.reshape(N, C, 1)
    b3 = b_sel.reshape(N, C, 1)

    cblk = _plan_fused_cblk(N, C, HW, itemsize, block_bytes)

    # --- path 1: fused single-pass (whole-HW channel slabs) ------------------
    if cblk is not None:
        chunk = _choose_chunk(HW)
        n_chunks = HW // chunk
        out3 = pl.pallas_call(
            functools.partial(_ccbn_fused_kernel, eps=float(eps),
                              chunk=chunk, n_chunks=n_chunks),
            out_shape=jax.ShapeDtypeStruct((N, C, HW), x.dtype),
            grid_spec=pltpu.PrefetchScalarGridSpec(
                num_scalar_prefetch=0, grid=(pl.cdiv(C, cblk),),
                in_specs=[
                    pl.BlockSpec((N, cblk, HW), lambda c: (0, c, 0)),
                    pl.BlockSpec((N, C, 1), lambda c: (0, 0, 0)),   # loaded once
                    pl.BlockSpec((N, C, 1), lambda c: (0, 0, 0)),   # loaded once
                ],
                out_specs=pl.BlockSpec((N, cblk, HW), lambda c: (0, c, 0))),
            compiler_params=pltpu.CompilerParams(
                dimension_semantics=("parallel",),
                vmem_limit_bytes=_VMEM_LIMIT),
        )(x3, w3, b3)
        return out3.reshape(N, C, H, W), cats

    # --- path 2: HW-tiled two-kernel fallback (stats then apply) -------------
    cblk, hblk = _plan_fallback(N, C, HW, itemsize, block_bytes)
    n_c = pl.cdiv(C, cblk)
    n_h = pl.cdiv(HW, hblk)

    mean3, var3 = pl.pallas_call(
        functools.partial(_ccbn_stats_kernel, total_count=N * HW),
        out_shape=(jax.ShapeDtypeStruct((1, C, 1), jnp.float32),
                   jax.ShapeDtypeStruct((1, C, 1), jnp.float32)),
        grid_spec=pltpu.PrefetchScalarGridSpec(
            num_scalar_prefetch=0, grid=(n_c, n_h),
            in_specs=[pl.BlockSpec((N, cblk, hblk), lambda c, h: (0, c, h))],
            out_specs=(pl.BlockSpec((1, cblk, 1), lambda c, h: (0, c, 0)),
                       pl.BlockSpec((1, cblk, 1), lambda c, h: (0, c, 0)))),
        compiler_params=pltpu.CompilerParams(
            dimension_semantics=("parallel", "arbitrary"),
            vmem_limit_bytes=_VMEM_LIMIT),
    )(x3)

    # Tiny per-(n, c) fold of stats + affine done in plain JAX (O(N*C) work).
    inv_std = lax.rsqrt(var3 + eps)                  # (1, C, 1)
    scale = w3 * inv_std                             # (N, C, 1)
    shift = b3 - mean3 * scale

    out3 = pl.pallas_call(
        _ccbn_apply_kernel,
        out_shape=jax.ShapeDtypeStruct((N, C, HW), x.dtype),
        grid_spec=pltpu.PrefetchScalarGridSpec(
            num_scalar_prefetch=0, grid=(n_c, n_h),
            in_specs=[
                pl.BlockSpec((N, cblk, hblk), lambda c, h: (0, c, h)),
                pl.BlockSpec((N, cblk, 1), lambda c, h: (0, c, 0)),
                pl.BlockSpec((N, cblk, 1), lambda c, h: (0, c, 0)),
            ],
            out_specs=pl.BlockSpec((N, cblk, hblk), lambda c, h: (0, c, h))),
        compiler_params=pltpu.CompilerParams(
            dimension_semantics=("parallel", "parallel"),
            vmem_limit_bytes=_VMEM_LIMIT),
    )(x3, scale, shift)

    return out3.reshape(N, C, H, W), cats


# ---------------------------------------------------------------------------
# Reference + test
# ---------------------------------------------------------------------------

def _reference(x, cats, weight, bias, eps=2e-5):
    xf = x.astype(jnp.float32)
    mean = jnp.mean(xf, axis=(0, 2, 3), keepdims=True)
    var = jnp.mean((xf - mean) ** 2, axis=(0, 2, 3), keepdims=True)
    x_hat = (xf - mean) * lax.rsqrt(var + eps)
    w = weight[cats][:, :, None, None]
    b = bias[cats][:, :, None, None]
    return (x_hat * w + b).astype(x.dtype)


if __name__ == "__main__":
    num_cats = 6
    eps = 2e-5

    def run_case(key, N, C, H, W, **kw):
        kx, kc, kwt, kbs = jax.random.split(key, 4)
        x = jax.random.normal(kx, (N, C, H, W), dtype=jnp.float32)
        cats = jax.random.randint(kc, (N,), 0, num_cats, dtype=jnp.int32)
        # Module __init__ shapes: weight/bias are (num_cats, num_features);
        # use random values so the category-conditioned gather is exercised.
        weight = 1.0 + 0.1 * jax.random.normal(kwt, (num_cats, C), dtype=jnp.float32)
        bias = 0.1 * jax.random.normal(kbs, (num_cats, C), dtype=jnp.float32)

        out, out_cats = categorical_conditional_batch_norm(
            x, cats, weight, bias, eps=eps, **kw)
        out = jax.block_until_ready(out)

        ref = _reference(x, cats, weight, bias, eps=eps)
        assert jnp.allclose(out, ref, atol=1e-4, rtol=1e-4), (
            f"mismatch vs reference for N={N} C={C} H={H} W={W} kw={kw}")
        assert jnp.array_equal(out_cats, cats)

    k1, k2, k3 = jax.random.split(jax.random.PRNGKey(0), 3)
    # 1) Fused single-pass path: channel-tiled grid + in-kernel HW chunk loop.
    run_case(k1, 2, 16, 32, 32)
    # 2) Lane-dense path for small feature maps (HW < 128).
    run_case(k2, 2, 16, 8, 8)
    # 3) HW-tiled two-kernel fallback (forced via a tiny per-block budget).
    run_case(k3, 2, 16, 16, 16, block_bytes=1024)

    print("KERNEL_OK")
</pallas_src>

<mosaic_0001>
module attributes {stable_mosaic.version = 11 : i64} {
  func.func @_ccbn_fused_kernel(%arg0: i32, %arg1: memref<2x8x1024xf32, #tpu.memory_space<vmem>>, %arg2: memref<2x16x1xf32, #tpu.memory_space<vmem>>, %arg3: memref<2x16x1xf32, #tpu.memory_space<vmem>>, %arg4: memref<2x8x1024xf32, #tpu.memory_space<vmem>>) attributes {dimension_semantics = [#tpu.dimension_semantics<parallel>], iteration_bounds = array<i64: 2>, scalar_prefetch = 0 : i64, scratch_operands = 0 : i64, tpu.core_type = #tpu.core_type<tc>, window_params = [{transform_indices = @transform_0, window_bounds = array<i64: 2, 8, 1024>}, {pipeline_mode = #tpu.pipeline_mode<synchronous>, transform_indices = @transform_1, window_bounds = array<i64: 2, 16, 1>}, {pipeline_mode = #tpu.pipeline_mode<synchronous>, transform_indices = @transform_2, window_bounds = array<i64: 2, 16, 1>}, {transform_indices = @transform_3, window_bounds = array<i64: 2, 8, 1024>}]} {
    %c8_i32 = arith.constant 8 : i32
    %0 = arith.muli %arg0, %c8_i32 : i32
    %1 = tpu.assume_multiple %0, 8 : i32
    %cst = arith.constant 0.000000e+00 : f32
    %2 = vector.broadcast %cst : f32 to vector<1x8x1xf32>
    %c0_i32 = arith.constant 0 : i32
    %c512_i32 = arith.constant 512 : i32
    %3 = arith.muli %c0_i32, %c512_i32 : i32
    %4 = tpu.assume_multiple %3, 512 : i32
    %c0 = arith.constant 0 : index
    %c0_0 = arith.constant 0 : index
    %5 = arith.index_cast %4 : i32 to index
    %6 = vector.load %arg1[%c0, %c0_0, %5] : memref<2x8x1024xf32, #tpu.memory_space<vmem>>, vector<2x8x512xf32>
    %cst_1 = arith.constant dense<0.000000e+00> : vector<8xf32>
    %7 = vector.multi_reduction <add>, %6, %cst_1 [0, 2] : vector<2x8x512xf32> to vector<8xf32>
    %8 = vector.shape_cast %7 : vector<8xf32> to vector<1x8x1xf32>
    %9 = arith.addf %2, %8 : vector<1x8x1xf32>
    %c1_i32 = arith.constant 1 : i32
    %c512_i32_2 = arith.constant 512 : i32
    %10 = arith.muli %c1_i32, %c512_i32_2 : i32
    %11 = tpu.assume_multiple %10, 512 : i32
    %c0_3 = arith.constant 0 : index
    %c0_4 = arith.constant 0 : index
    %12 = arith.index_cast %11 : i32 to index
    %13 = vector.load %arg1[%c0_3, %c0_4, %12] : memref<2x8x1024xf32, #tpu.memory_space<vmem>>, vector<2x8x512xf32>
    %cst_5 = arith.constant dense<0.000000e+00> : vector<8xf32>
    %14 = vector.multi_reduction <add>, %13, %cst_5 [0, 2] : vector<2x8x512xf32> to vector<8xf32>
    %15 = vector.shape_cast %14 : vector<8xf32> to vector<1x8x1xf32>
    %16 = arith.addf %9, %15 : vector<1x8x1xf32>
    %c2_i32 = arith.constant 2 : i32
    %cst_6 = arith.constant 4.8828125E-4 : f32
    %17 = vector.broadcast %cst_6 : f32 to vector<1x8x1xf32>
    %18 = arith.mulf %16, %17 : vector<1x8x1xf32>
    %cst_7 = arith.constant 0.000000e+00 : f32
    %19 = vector.broadcast %cst_7 : f32 to vector<1x8x1xf32>
    %c0_i32_8 = arith.constant 0 : i32
    %c512_i32_9 = arith.constant 512 : i32
    %20 = arith.muli %c0_i32_8, %c512_i32_9 : i32
    %21 = tpu.assume_multiple %20, 512 : i32
    %c0_10 = arith.constant 0 : index
    %c0_11 = arith.constant 0 : index
    %22 = arith.index_cast %21 : i32 to index
    %23 = vector.load %arg1[%c0_10, %c0_11, %22] : memref<2x8x1024xf32, #tpu.memory_space<vmem>>, vector<2x8x512xf32>
    %24 = vector.broadcast %18 : vector<1x8x1xf32> to vector<2x8x512xf32>
    %25 = arith.subf %23, %24 : vector<2x8x512xf32>
    %26 = arith.mulf %25, %25 : vector<2x8x512xf32>
    %cst_12 = arith.constant dense<0.000000e+00> : vector<8xf32>
    %27 = vector.multi_reduction <add>, %26, %cst_12 [0, 2] : vector<2x8x512xf32> to vector<8xf32>
    %28 = vector.shape_cast %27 : vector<8xf32> to vector<1x8x1xf32>
    %29 = arith.addf %19, %28 : vector<1x8x1xf32>
    %c1_i32_13 = arith.constant 1 : i32
    %c512_i32_14 = arith.constant 512 : i32
    %30 = arith.muli %c1_i32_13, %c512_i32_14 : i32
    %31 = tpu.assume_multiple %30, 512 : i32
    %c0_15 = arith.constant 0 : index
    %c0_16 = arith.constant 0 : index
    %32 = arith.index_cast %31 : i32 to index
    %33 = vector.load %arg1[%c0_15, %c0_16, %32] : memref<2x8x1024xf32, #tpu.memory_space<vmem>>, vector<2x8x512xf32>
    %34 = vector.broadcast %18 : vector<1x8x1xf32> to vector<2x8x512xf32>
    %35 = arith.subf %33, %34 : vector<2x8x512xf32>
    %36 = arith.mulf %35, %35 : vector<2x8x512xf32>
    %cst_17 = arith.constant dense<0.000000e+00> : vector<8xf32>
    %37 = vector.multi_reduction <add>, %36, %cst_17 [0, 2] : vector<2x8x512xf32> to vector<8xf32>
    %38 = vector.shape_cast %37 : vector<8xf32> to vector<1x8x1xf32>
    %39 = arith.addf %29, %38 : vector<1x8x1xf32>
    %c2_i32_18 = arith.constant 2 : i32
    %cst_19 = arith.constant 4.8828125E-4 : f32
    %40 = vector.broadcast %cst_19 : f32 to vector<1x8x1xf32>
    %41 = arith.mulf %39, %40 : vector<1x8x1xf32>
    %cst_20 = arith.constant 2.000000e-05 : f32
    %42 = vector.broadcast %cst_20 : f32 to vector<1x8x1xf32>
    %43 = arith.addf %41, %42 : vector<1x8x1xf32>
    %44 = math.rsqrt %43 : vector<1x8x1xf32>
    %c0_21 = arith.constant 0 : index
    %45 = arith.index_cast %1 : i32 to index
    %c0_22 = arith.constant 0 : index
    %46 = vector.load %arg2[%c0_21, %45, %c0_22] : memref<2x16x1xf32, #tpu.memory_space<vmem>>, vector<2x8x1xf32>
    %c0_23 = arith.constant 0 : index
    %47 = arith.index_cast %1 : i32 to index
    %c0_24 = arith.constant 0 : index
    %48 = vector.load %arg3[%c0_23, %47, %c0_24] : memref<2x16x1xf32, #tpu.memory_space<vmem>>, vector<2x8x1xf32>
    %49 = vector.broadcast %44 : vector<1x8x1xf32> to vector<2x8x1xf32>
    %50 = arith.mulf %49, %46 : vector<2x8x1xf32>
    %51 = vector.broadcast %18 : vector<1x8x1xf32> to vector<2x8x1xf32>
    %52 = arith.mulf %51, %50 : vector<2x8x1xf32>
    %53 = arith.subf %48, %52 : vector<2x8x1xf32>
    %54 = vector.shape_cast %50 : vector<2x8x1xf32> to vector<2x8x1xf32>
    %55 = vector.broadcast %54 : vector<2x8x1xf32> to vector<2x8x512xf32>
    %56 = vector.shape_cast %53 : vector<2x8x1xf32> to vector<2x8x1xf32>
    %57 = vector.broadcast %56 : vector<2x8x1xf32> to vector<2x8x512xf32>
    %c0_i32_25 = arith.constant 0 : i32
    %c512_i32_26 = arith.constant 512 : i32
    %58 = arith.muli %c0_i32_25, %c512_i32_26 : i32
    %59 = tpu.assume_multiple %58, 512 : i32
    %c0_27 = arith.constant 0 : index
    %c0_28 = arith.constant 0 : index
    %60 = arith.index_cast %59 : i32 to index
    %61 = vector.load %arg1[%c0_27, %c0_28, %60] : memref<2x8x1024xf32, #tpu.memory_space<vmem>>, vector<2x8x512xf32>
    %62 = arith.mulf %61, %55 : vector<2x8x512xf32>
    %63 = arith.addf %62, %57 : vector<2x8x512xf32>
    %c0_29 = arith.constant 0 : index
    %c0_30 = arith.constant 0 : index
    %64 = arith.index_cast %59 : i32 to index
    %65 = vector.load %arg4[%c0_29, %c0_30, %64] : memref<2x8x1024xf32, #tpu.memory_space<vmem>>, vector<2x8x512xf32>
    tpu.vector_store %arg4[%c0_29, %c0_30, %64], %63 {strides = array<i32>} : memref<2x8x1024xf32, #tpu.memory_space<vmem>>, vector<2x8x512xf32>,
    %c1_i32_31 = arith.constant 1 : i32
    %c512_i32_32 = arith.constant 512 : i32
    %66 = arith.muli %c1_i32_31, %c512_i32_32 : i32
    %67 = tpu.assume_multiple %66, 512 : i32
    %c0_33 = arith.constant 0 : index
    %c0_34 = arith.constant 0 : index
    %68 = arith.index_cast %67 : i32 to index
    %69 = vector.load %arg1[%c0_33, %c0_34, %68] : memref<2x8x1024xf32, #tpu.memory_space<vmem>>, vector<2x8x512xf32>
    %70 = arith.mulf %69, %55 : vector<2x8x512xf32>
    %71 = arith.addf %70, %57 : vector<2x8x512xf32>
    %c0_35 = arith.constant 0 : index
    %c0_36 = arith.constant 0 : index
    %72 = arith.index_cast %67 : i32 to index
    %73 = vector.load %arg4[%c0_35, %c0_36, %72] : memref<2x8x1024xf32, #tpu.memory_space<vmem>>, vector<2x8x512xf32>
    tpu.vector_store %arg4[%c0_35, %c0_36, %72], %71 {strides = array<i32>} : memref<2x8x1024xf32, #tpu.memory_space<vmem>>, vector<2x8x512xf32>,
    %c2_i32_37 = arith.constant 2 : i32
    return
  }
  func.func @transform_0(%arg0: i32) -> (i32, i32, i32) {
    %c0_i32 = arith.constant 0 : i32
    %c0_i32_0 = arith.constant 0 : i32
    %c0_i32_1 = arith.constant 0 : i32
    return %c0_i32, %arg0, %c0_i32_0 : i32, i32, i32
  }
  func.func @transform_1(%arg0: i32) -> (i32, i32, i32) {
    %c0_i32 = arith.constant 0 : i32
    %c0_i32_0 = arith.constant 0 : i32
    %c0_i32_1 = arith.constant 0 : i32
    %c0_i32_2 = arith.constant 0 : i32
    return %c0_i32, %c0_i32_0, %c0_i32_1 : i32, i32, i32
  }
  func.func @transform_2(%arg0: i32) -> (i32, i32, i32) {
    %c0_i32 = arith.constant 0 : i32
    %c0_i32_0 = arith.constant 0 : i32
    %c0_i32_1 = arith.constant 0 : i32
    %c0_i32_2 = arith.constant 0 : i32
    return %c0_i32, %c0_i32_0, %c0_i32_1 : i32, i32, i32
  }
  func.func @transform_3(%arg0: i32) -> (i32, i32, i32) {
    %c0_i32 = arith.constant 0 : i32
    %c0_i32_0 = arith.constant 0 : i32
    %c0_i32_1 = arith.constant 0 : i32
    return %c0_i32, %arg0, %c0_i32_0 : i32, i32, i32
  }
}

</mosaic_0001>

<bundles_post_ra>
// kernel: tpu_custom_call.1
= control target key start
LH: loop header
LB: loop body
LE: loop exit
PB: predicated region body
PF: predicated region fallthrough
CT: control target
= control target key end

     0   :  { %8 = vsyncpa [#allocation3], 0  ;;  %s982_s0 = inlined_call_operand.hbm [shape: f32[2,16,1024], index: 0, kind: input, shape index: {}]   ;;  %s983_s1 = inlined_call_operand.vmem [shape: f32[2,16,1], index: 1, kind: input, shape index: {}]   ;;  %s984_s2 = inlined_call_operand.vmem [shape: f32[2,16,1], index: 2, kind: input, shape index: {}]   ;;  %s985_s3 = inlined_call_operand.hbm [shape: f32[2,16,1024], index: 3, kind: output, shape index: {}]  }
   0x1   :  { %10 = vsyncpa [#allocation3 + $0x1], 0 }
   0x2   :  { %11 = vsyncpa [#allocation4], 0 }
   0x3   :  { %13 = vsyncpa [#allocation4 + $0x1], 0  ;;  %s688_s12 = smov 0   ;;  %s690_s13 = smov 0  }
   0x4   :  { %s692_s14 = smov 0   ;;  %s694_s15 = smov 0  }
   0x5 LB: > { %s709_s16 = sadd.s32 4294967295, %s657_s15   ;;  %s463_s17 = sadd.s32 4294967294, %s657_s15   ;;  %s657_s15 = sphi %s694_s15, %s999_s15   ;;  %s653_s14 = sphi %s692_s14, %s998_s14   ;;  %s649_s13 = sphi %s690_s13, %s997_s13   ;;  %s645_s12 = sphi %s688_s12, %s996_s12  }
   0x6   : > { %s713_s18 = sadd.s32 1, %s657_s15   ;;  %s26_s19 = sadd.s32 1, %s653_s14 }
   0x7   : > { %s23_s20 = ssub.s32 %s657_s15, %s713_s18  ;;  %p33_p0 = scmp.ne.s32.totalorder %s653_s14, %s649_s13 }
   0x8   : > { %p24_p1 = scmp.eq.s32.totalorder %s23_s20, 0  ;;  %p34_p2 = scmp.eq.s32.totalorder %s657_s15, 0 }
   0x9   : > { %p39_p3 = scmp.ne.s32.totalorder %s649_s13, %s645_s12  ;;  %p40_p4 = scmp.eq.s32.totalorder %s709_s16, 0 }
   0xa   : > { %s725_s21 = scalar_select %p24_p1, %s653_s14, %s26_s19  }
   0xb   : > { %p727_p5 = por %p34_p2, %p33_p0  ;;  %p731_p6 = por %p40_p4, %p39_p3 }
   0xc   : > { %p105_p7 = scmp.eq.s32.totalorder %s709_s16, 1  ;;  %p111_p8 = scmp.eq.s32.totalorder %s463_s17, 1 }
   0xd   : > { %p516_p10 = scmp.lt.s32.totalorder %s657_s15, 2  ;;  %s137_s26 = sand.u32 1, %s653_s14  }
   0xe   : > { %p738_p11 = por %p105_p7, %p33_p0  ;;  %p742_p12 = por %p111_p8, %p39_p3 }
   0xf   : > { %s502_s27 = sshll.u32 %s657_s15, 10  ;;  %s466_s28 = sshll.u32 %s137_s26, 7 }
  0x10   : > { %s989_s24 = scalar_select %p738_p11, 1, 0 }
  0x11   : > { %s990_s25 = scalar_select %p742_p12, 1, 0 }
  0x12   : > { %s751_s4 = scalar_lea.hbm %s982_s0, %s502_s27  ;;  %s141_s5 = scalar_lea.vmem [#allocation2], %s466_s28 }
  0x13   : > { %s148_s6 = sshll.u32 %s141_s5, 4  ;;  %p755_p13 = pnand %p516_p10, %p727_p5  ;;  %s759_s6 = int_to_ptr.vmem [resolvable:$true] %s148_s6 }
  0x14   : > { %s762_s8 = scalar_lea.sflag [#allocation3], %s137_s26  ;;  %s561_s9 = scalar_lea.hbm %s751_s4, 2048 }
  0x15   : > { %p562_p1 = scmp.ne.s32.totalorder %s751_s4, %s561_s9  ;;  %p563_p2 = pneg %p755_p13 }
  0x16   : > { %s566_s17 = scalar_lea.hbm %s982_s0, 4096  ;;  %p567_p5 = scmp.lt.u32.totalorder %s751_s4, %s982_s0 }
  0x17   : > { %p564_p3 = pnand %p563_p2, %p562_p1  ;;  %p568_p7 = scmp.lt.u32.totalorder %s566_s17, %s561_s9 }
  0x18   : > { %p570_p10 = scmp.lt.u32.totalorder %s561_s9, %s751_s4 }
  0x19   : > { %p565_p4 = pneg %p564_p3  ;;  %p569_p8 = por %p568_p7, %p567_p5 }
  0x1b   : > { %p571_p9 = por %p570_p10, %p569_p8 }
  0x1d   : > { %p572_p0 = pnand %p571_p9, %p565_p4 }
  0x1f   : > { %575 = shalt.err (!%p572_p0)
}
  0x20   : > { %s576_s22 = scalar_lea.vmem %s759_s6, 2048  ;;  %s659_s26 = smov [#allocation2]  }
  0x21   : > { %p577_p1 = scmp.ne.s32.totalorder %s759_s6, %s576_s22  ;;  %s581_s27 = sshll.u32 %s659_s26, 4  ;;  %s582_s27 = int_to_ptr.vmem [resolvable:$false] %s581_s27 }
  0x22   : > { %s583_s28 = scalar_lea.vmem %s582_s27, 4096  ;;  %p584_p11 = scmp.lt.s32.totalorder %s759_s6, %s582_s27 }
  0x23   : > { %p579_p3 = pnand %p577_p1, %p563_p2  ;;  %p585_p5 = scmp.lt.s32.totalorder %s583_s28, %s576_s22 }
  0x25   : > { %p580_p12 = pneg %p579_p3  ;;  %p586_p7 = por %p585_p5, %p584_p11 }
  0x27   : > { %p587_p8 = pnand %p586_p7, %p580_p12 }
  0x29   : > { %590 = shalt.err (!%p587_p8)
}
  0x2a   : > { %s660_s29 = smov 2048   ;;  %s661_s30 = smov 1024  }
  0x2b   : > { %s662_s5 = smov 64   ;;  %p156_p9 = scmp.lt.s32.totalorder %s657_s15, 3 }
  0x2c   : > { %511 = dma.hbm_to_vmem [thread:$0]  (!%p755_p13), %s751_s4, 2048, %s759_s6, %s762_s8, %s660_s29, %s661_s30, %s662_s5  }
  0x2d   : > { %p992_p0 = scmp.ge.s32.totalorder %s657_s15, 1 }
  0x2f   : > { %p157_p2 = pnand %p992_p0, %p156_p9 }
  0x30   : > { %s794_s9 = sand.u32 (!%p157_p2), 1, %s649_s13  }
  0x31   : > { %160 = sbr.rel (%p157_p2) target bundleno = 562 (0x232), region = 32  ;;  %s470_s10 = sshll.u32 (!%p157_p2), %s794_s9, 7 }
  0x32   : > { %s163_s11 = scalar_lea.sflag (!%p157_p2), [#allocation3], %s794_s9  ;;  %s166_s17 = scalar_lea.vmem (!%p157_p2), [#allocation2], %s470_s10 }
  0x38   : > { %636 = dma.done.wait (%p731_p6), %s163_s11, 2048  }
  0x39   : > { %638 = vsyncadd (%p731_p6), %s163_s11, 4294965248  ;;  %v804_v0 = vld [vmem:[%s166_s17] sm:$0xff]  ;;  %v806_v1 = vld [vmem:[%s166_s17 + $0x8] sm:$0xff]  ;;  %s472_s23 = sshll.u32 %s709_s16, 3  ;;  %s503_s22 = sshll.u32 %s709_s16, 10 }
  0x3a   : > { %v808_v2 = vld [vmem:[%s166_s17 + $0x10] sm:$0xff]  ;;  %v198_v3 = vadd.f32 %v806_v1, %v804_v0  ;;  %v812_v4 = vld [vmem:[%s166_s17 + $0x18] sm:$0xff]  ;;  %v814_v5 = vld [vmem:[%s166_s17 + $0x20] sm:$0xff]  ;;  %s283_s7 = scalar_lea.vmem %s983_s1, %s472_s23  ;;  %s286_s20 = scalar_lea.vmem %s984_s2, %s472_s23 }
  0x3b   : > { %v817_v7 = vld [vmem:[%s166_s17 + $0x28] sm:$0xff]  ;;  %v819_v8 = vld [vmem:[%s166_s17 + $0x30] sm:$0xff]  ;;  %v821_v9 = vld [vmem:[%s166_s17 + $0x40] sm:$0xff]  ;;  %s906_s26 = scalar_lea.vmem [#allocation5], %s470_s10  ;;  %s928_s29 = scalar_lea.hbm %s985_s3, %s503_s22 }
  0x3c   : > { %v199_v6 = vadd.f32 %v198_v3, %v808_v2  ;;  %v217_v10 = vadd.f32 %v817_v7, %v814_v5  ;;  %v826_v12 = vld [vmem:[%s166_s17 + $0x38] sm:$0xff]  ;;  %v828_v13 = vld [vmem:[%s166_s17 + $0x48] sm:$0xff]  ;;  %v832_v16 = vld [vmem:[%s166_s17 + $0x60] sm:$0xff]  ;;  %s386_s27 = sshll.u32 %s906_s26, 4  ;;  %s373_s30 = scalar_lea.sflag [#allocation4], %s794_s9  ;;  %s930_s27 = int_to_ptr.vmem [resolvable:$true] %s386_s27 }
  0x3d   : > { %v834_v17 = vld [vmem:[%s166_s17 + $0x50] sm:$0xff]  ;;  %v838_v20 = vld [vmem:[%s166_s17 + $0x68] sm:$0xff]  ;;  %v840_v21 = vld [vmem:[%s166_s17 + $0x58] sm:$0xff]  ;;  %s591_s5 = scalar_lea.vmem %s930_s27, 2048  ;;  %p993_p11 = scmp.ne.s32.totalorder %s989_s24, 0 }
  0x3e   : > { %v200_v11 = vadd.f32 %v199_v6, %v812_v4  ;;  %v218_v14 = vadd.f32 %v819_v8, %v217_v10  ;;  %v844_v24 = vld [vmem:[%s166_s17 + $0x70] sm:$0xff]  ;;  %v848_v27 = vld [vmem:[%s166_s17 + $0x78] sm:$0xff]  ;;  %p592_p6 = scmp.ne.s32.totalorder %s930_s27, %s591_s5  ;;  %s664_s10 = smov [#allocation5]  }
  0x3f   : > { %s595_s11 = sshll.u32 %s664_s10, 4  ;;  %s596_s11 = int_to_ptr.vmem [resolvable:$false] %s595_s11 }
  0x40   : > { %v201_v15 = vadd.f32 %v200_v11, %v821_v9  ;;  %v219_v18 = vadd.f32 %v826_v12, %v218_v14  ;;  %p593_p12 = pnand %p592_p6, %p993_p11  ;;  %s597_s17 = scalar_lea.vmem %s596_s11, 4096 }
  0x41   : > { %p598_p4 = scmp.lt.s32.totalorder %s930_s27, %s596_s11  ;;  %p599_p10 = scmp.lt.s32.totalorder %s597_s17, %s591_s5 }
  0x42   : > { %v202_v19 = vadd.f32 %v201_v15, %v828_v13  ;;  %v220_v22 = vadd.f32 %v832_v16, %v219_v18  ;;  %p594_p13 = pneg %p593_p12 }
  0x43   : > { %p600_p1 = por %p599_p10, %p598_p4 }
  0x44   : > { %v203_v23 = vadd.f32 %v202_v19, %v834_v17  ;;  %v221_v25 = vadd.f32 %v838_v20, %v220_v22 }
  0x45   : > { %p601_p3 = pnand %p600_p1, %p594_p13 }
  0x46   : > { %v204_v26 = vadd.f32 %v203_v23, %v840_v21  ;;  %v222_v28 = vadd.f32 %v844_v24, %v221_v25 }
  0x48   : > { %205 = vadd.xlane.f32.xlu0 %v204_v26  ;;  %v223_v29 = vadd.f32 %v848_v27, %v222_v28 }
  0x4c   : > { %224 = vadd.xlane.f32.xlu0 %v223_v29 }
  0xd5   : > { %v206_v30 = vpop.xlane.xlu0 %205 }
  0xd9   : > { %v225_v31 = vpop.xlane.xlu0 %224 }
  0xda   : > { %v226_v32 = vadd.f32 %v225_v31, %v206_v30 }
  0xdc   : > { %v852_v33 = vmul.f32 0.00048828125, %v226_v32  ;;  %v663_v32 = vmov 0  }
  0xdd   : > { %558 = vset.pattern.permute.xlu1 %v663_v32  ;;  %557 = vset.pattern.permute.xlu0 %v663_v32 }
  0xde   : > { %v228_v34 = vsub.f32 %v804_v0, %v852_v33  ;;  %v229_v35 = vsub.f32 %v806_v1, %v852_v33  ;;  %v230_v36 = vsub.f32 %v808_v2, %v852_v33  ;;  %v231_v37 = vsub.f32 %v812_v4, %v852_v33 }
  0xdf   : > { %v232_v40 = vsub.f32 %v821_v9, %v852_v33  ;;  %v254_v43 = vsub.f32 %v814_v5, %v852_v33  ;;  %v255_v44 = vsub.f32 %v817_v7, %v852_v33  ;;  %v256_v45 = vsub.f32 %v819_v8, %v852_v33 }
  0xe0   : > { %v236_v38 = vmul.f32 %v228_v34, %v228_v34  ;;  %v237_v39 = vmul.f32 %v229_v35, %v229_v35  ;;  %v238_v41 = vmul.f32 %v230_v36, %v230_v36  ;;  %v233_v46 = vsub.f32 %v828_v13, %v852_v33 }
  0xe1   : > { %v239_v47 = vmul.f32 %v231_v37, %v231_v37  ;;  %v257_v49 = vsub.f32 %v826_v12, %v852_v33  ;;  %v262_v50 = vmul.f32 %v254_v43, %v254_v43  ;;  %v263_v51 = vmul.f32 %v255_v44, %v255_v44  ;;  %v287_v44 = vld [vmem:[%s286_s20] sm:$0xff] }
  0xe2   : > { %v244_v42 = vadd.f32 %v237_v39, %v236_v38  ;;  %v234_v52 = vsub.f32 %v834_v17, %v852_v33  ;;  %v240_v53 = vmul.f32 %v232_v40, %v232_v40  ;;  %v258_v55 = vsub.f32 %v832_v16, %v852_v33  ;;  %v285_v39 = vld [vmem:[%s283_s7 + $0x10] sm:$0xff]  ;;  %v284_v40 = vld [vmem:[%s283_s7] sm:$0xff] }
  0xe3   : > { %v264_v56 = vmul.f32 %v256_v45, %v256_v45  ;;  %v270_v57 = vadd.f32 %v263_v51, %v262_v50  ;;  %v235_v58 = vsub.f32 %v840_v21, %v852_v33  ;;  %v241_v59 = vmul.f32 %v233_v46, %v233_v46 }
  0xe4   : > { %v245_v48 = vadd.f32 %v244_v42, %v238_v41  ;;  %v259_v61 = vsub.f32 %v838_v20, %v852_v33  ;;  %v265_v62 = vmul.f32 %v257_v49, %v257_v49  ;;  %v242_v3 = vmul.f32 %v234_v52, %v234_v52 }
  0xe5   : > { %v271_v63 = vadd.f32 %v270_v57, %v264_v56  ;;  %v260_v10 = vsub.f32 %v844_v24, %v852_v33  ;;  %v266_v11 = vmul.f32 %v258_v55, %v258_v55  ;;  %v243_v15 = vmul.f32 %v235_v58, %v235_v58 }
  0xe6   : > { %v246_v54 = vadd.f32 %v245_v48, %v239_v47  ;;  %v261_v19 = vsub.f32 %v848_v27, %v852_v33  ;;  %v267_v22 = vmul.f32 %v259_v61, %v259_v61  ;;  %v288_v48 = vld [vmem:[%s286_s20 + $0x10] sm:$0xff] }
  0xe7   : > { %v272_v14 = vadd.f32 %v271_v63, %v265_v62  ;;  %v268_v26 = vmul.f32 %v260_v10, %v260_v10 }
  0xe8   : > { %v247_v60 = vadd.f32 %v246_v54, %v240_v53  ;;  %v269_v29 = vmul.f32 %v261_v19, %v261_v19 }
  0xe9   : > { %v273_v23 = vadd.f32 %v272_v14, %v266_v11 }
  0xea   : > { %v248_v6 = vadd.f32 %v247_v60, %v241_v59 }
  0xeb   : > { %v274_v28 = vadd.f32 %v273_v23, %v267_v22 }
  0xec   : > { %v249_v18 = vadd.f32 %v248_v6, %v242_v3 }
  0xed   : > { %v275_v30 = vadd.f32 %v274_v28, %v268_v26 }
  0xee   : > { %v250_v25 = vadd.f32 %v249_v18, %v243_v15 }
  0xef   : > { %v276_v31 = vadd.f32 %v275_v30, %v269_v29 }
  0xf0   : > { %251 = vadd.xlane.f32.xlu1 %v250_v25 }
  0xf4   : > { %277 = vadd.xlane.f32.xlu1 %v276_v31 }
 0x17d   : > { %v252_v34 = vpop.xlane.xlu1 %251 }
 0x181   : > { %v278_v35 = vpop.xlane.xlu1 %277 }
 0x182   : > { %v279_v36 = vadd.f32 %v278_v35, %v252_v34 }
 0x184   : > { %v280_v37 = vmul.f32 0.00048828125, %v279_v36 }
 0x186   : > { %v281_v38 = vadd.f32 2e-05, %v280_v37 }
 0x188   : > { %559 = vrsqrt.f32 %v281_v38 }
 0x192   : > { %v560_v41 = vpop.eup %559 }
 0x193   : > { %v290_v42 = vmul.f32 %v560_v41, %v285_v39  ;;  %v289_v43 = vmul.f32 %v560_v41, %v284_v40 }
 0x195   : > { %302 = vperm.xlu1 %558, %v290_v42   ;;  %297 = vperm.xlu0 %557, %v289_v43   ;;  %v291_v45 = vmul.f32 %v289_v43, %v852_v33  ;;  %v292_v47 = vmul.f32 %v290_v42, %v852_v33 }
 0x197   : > { %v293_v46 = vsub.f32 %v287_v44, %v291_v45  ;;  %v294_v49 = vsub.f32 %v288_v48, %v292_v47 }
 0x199   : > { %307 = vperm.xlu1 %558, %v293_v46  }
 0x19d   : > { %312 = vperm.xlu1 %558, %v294_v49  }
 0x214   : > { %v303_v50 = vpop.permute.xlu1 %302  ;;  %v298_v51 = vpop.permute.xlu0 %297 }
 0x215   : > { %v315_v52 = vmul.f32 %v298_v51, %v804_v0  ;;  %v316_v53 = vmul.f32 %v298_v51, %v806_v1  ;;  %v317_v54 = vmul.f32 %v298_v51, %v808_v2  ;;  %v318_v55 = vmul.f32 %v298_v51, %v812_v4 }
 0x216   : > { %v347_v56 = vmul.f32 %v814_v5, %v298_v51  ;;  %v348_v33 = vmul.f32 %v817_v7, %v298_v51  ;;  %v349_v57 = vmul.f32 %v819_v8, %v298_v51  ;;  %v350_v58 = vmul.f32 %v826_v12, %v298_v51 }
 0x217   : > { %v319_v4 = vmul.f32 %v303_v50, %v821_v9  ;;  %v320_v5 = vmul.f32 %v303_v50, %v828_v13  ;;  %v321_v7 = vmul.f32 %v303_v50, %v834_v17  ;;  %v322_v8 = vmul.f32 %v303_v50, %v840_v21 }
 0x218   : > { %v308_v59 = vpop.permute.xlu1 %307  ;;  %v351_v12 = vmul.f32 %v832_v16, %v303_v50  ;;  %v352_v6 = vmul.f32 %v838_v20, %v303_v50  ;;  %v353_v10 = vmul.f32 %v844_v24, %v303_v50  ;;  %v354_v9 = vmul.f32 %v848_v27, %v303_v50 }
 0x219   : > { %v323_v60 = vadd.f32 %v315_v52, %v308_v59  ;;  %v324_v61 = vadd.f32 %v316_v53, %v308_v59  ;;  %v325_v62 = vadd.f32 %v317_v54, %v308_v59  ;;  %v326_v0 = vadd.f32 %v318_v55, %v308_v59 }
 0x21a   : > { %v355_v1 = vadd.f32 %v347_v56, %v308_v59  ;;  %v356_v63 = vadd.f32 %v348_v33, %v308_v59  ;;  %v357_v2 = vadd.f32 %v349_v57, %v308_v59  ;;  %v358_v3 = vadd.f32 %v350_v58, %v308_v59 }
 0x21b   : > { %331 = vst [vmem:[%s906_s26] sm:$0xff] %v323_v60  ;;  %332 = vst [vmem:[%s906_s26 + $0x8] sm:$0xff] %v324_v61 }
 0x21c   : > { %333 = vst [vmem:[%s906_s26 + $0x10] sm:$0xff] %v325_v62  ;;  %334 = vst [vmem:[%s906_s26 + $0x18] sm:$0xff] %v326_v0  ;;  %v313_v13 = vpop.permute.xlu1 %312 }
 0x21d   : > { %489 = vst [vmem:[%s906_s26 + $0x20] sm:$0xff] %v355_v1  ;;  %490 = vst [vmem:[%s906_s26 + $0x28] sm:$0xff] %v356_v63  ;;  %v327_v17 = vadd.f32 %v319_v4, %v313_v13  ;;  %v328_v16 = vadd.f32 %v320_v5, %v313_v13  ;;  %v329_v20 = vadd.f32 %v321_v7, %v313_v13 }
 0x21e   : > { %491 = vst [vmem:[%s906_s26 + $0x30] sm:$0xff] %v357_v2  ;;  %492 = vst [vmem:[%s906_s26 + $0x38] sm:$0xff] %v358_v3  ;;  %v330_v21 = vadd.f32 %v322_v8, %v313_v13  ;;  %v359_v24 = vadd.f32 %v351_v12, %v313_v13  ;;  %v360_v27 = vadd.f32 %v352_v6, %v313_v13 }
 0x21f   : > { %v361_v11 = vadd.f32 %v353_v10, %v313_v13  ;;  %v362_v14 = vadd.f32 %v354_v9, %v313_v13  ;;  %335 = vst [vmem:[%s906_s26 + $0x40] sm:$0xff] %v327_v17  ;;  %336 = vst [vmem:[%s906_s26 + $0x48] sm:$0xff] %v328_v16 }
 0x220   : > { %337 = vst [vmem:[%s906_s26 + $0x50] sm:$0xff] %v329_v20  ;;  %338 = vst [vmem:[%s906_s26 + $0x58] sm:$0xff] %v330_v21 }
 0x221   : > { %493 = vst [vmem:[%s906_s26 + $0x60] sm:$0xff] %v359_v24  ;;  %494 = vst [vmem:[%s906_s26 + $0x68] sm:$0xff] %v360_v27 }
 0x222   : > { %495 = vst [vmem:[%s906_s26 + $0x70] sm:$0xff] %v361_v11  ;;  %496 = vst [vmem:[%s906_s26 + $0x78] sm:$0xff] %v362_v14 }
 0x223   : > { %604 = shalt.err (!%p601_p3)
}
 0x224   : > { %s605_s23 = scalar_lea.hbm %s928_s29, 2048  ;;  %s609_s7 = scalar_lea.hbm %s985_s3, 4096 }
 0x225   : > { %p606_p5 = scmp.ne.s32.totalorder %s928_s29, %s605_s23  ;;  %p610_p9 = scmp.lt.u32.totalorder %s928_s29, %s985_s3 }
 0x226   : > { %p611_p0 = scmp.lt.u32.totalorder %s609_s7, %s605_s23  ;;  %p613_p6 = scmp.lt.u32.totalorder %s605_s23, %s928_s29 }
 0x227   : > { %p607_p7 = pnand %p606_p5, %p993_p11 }
 0x228   : > { %p612_p2 = por %p611_p0, %p610_p9 }
 0x229   : > { %p608_p8 = pneg %p607_p7 }
 0x22a   : > { %p614_p12 = por %p613_p6, %p612_p2 }
 0x22c   : > { %p615_p13 = pnand %p614_p12, %p608_p8 }
 0x22e   : > { %618 = shalt.err (!%p615_p13)
}
 0x22f   : > { %s665_s20 = smov 1024   ;;  %s666_s22 = smov 2048  }
 0x230   : > { %s667_s26 = smov 64  }
 0x231   : > { %506 = dma.vmem_to_hbm [thread:$0]  (%p993_p11), %s930_s27, 2048, %s928_s29, %s373_s30, %s665_s20, %s666_s22, %s667_s26  }
 0x232 PF: > { %s401_s16 = sand.u32 1, %s645_s12   ;;  %p994_p4 = scmp.ne.s32.totalorder %s990_s25, 0 }
 0x233   : > { %p995_p10 = scmp.ge.s32.totalorder %s657_s15, 2  ;;  %s402_s28 = scalar_lea.sflag [#allocation4], %s401_s16 }
 0x235   : > { %p513_p1 = pnand %p995_p10, %p994_p4 }
 0x237   : > { %640 = dma.done.wait (!%p513_p1), %s402_s28, 2048  }
 0x238   : > { %642 = vsyncadd (!%p513_p1), %s402_s28, 4294965248  ;;  %p16_p3 = scmp.ge.s32.totalorder %s713_s18, 4   ;;  %s996_s12 = smov %s649_s13 }
 0x239   : > { %s997_s13 = smov %s653_s14  ;;  %s998_s14 = smov %s725_s21 }
 0x23a   : > { %s999_s15 = smov %s713_s18  ;;  %18 = sbr.rel (!%p16_p3) target bundleno = 5 (0x5), region = 81 }
 0x241   :  { %407 = vsyncpa [#allocation3], 1 }
 0x242   :  { %409 = vsyncpa [#allocation3 + $0x1], 1 }
 0x243   :  { %410 = vsyncpa [#allocation4], 1 }
 0x244   :  { %412 = vsyncpa [#allocation4 + $0x1], 1 }

</bundles_post_ra>
